<compile_context>
chip_gen: v7x
topology: tpu7x:2x2x1
jax: 0.10.0
libtpu: 0.0.40
codegen_flags: <defaults>
</compile_context>

<pallas_src>
import numpy as np

import jax
import jax.numpy as jnp
from jax.experimental import pallas as pl
from jax.experimental.pallas import tpu as pltpu

# ailLoss constants (from __init__)
ALPHA = 100.0
BIAS = 0.01
INV_WEI0 = float(1.0 + np.exp(-1.0 * BIAS * ALPHA))  # 1/wei0 == 1 + e^-1
SIGMA = 10.0
LAM = 0.15
RHO = 0.15

LANES = 128
SUBLANES = 8


def _ail_loss_kernel(lam_ref, outS_ref, outSp_ref, outT_ref, target_ref,
                     psum_ref):
    f32 = jnp.float32
    t = target_ref[...].astype(f32)
    oT = outT_ref[...].astype(f32)
    oS = outS_ref[...].astype(f32)
    oSp = outSp_ref[...].astype(f32)
    lam = lam_ref[0]  # precomputed LAM + RHO * curr

    # wei = 1 / (1 + exp(alpha * (|outT - target| - bias))) / wei0
    err = jnp.abs(oT - t)
    wei = pl.reciprocal(1.0 + jnp.exp((err - BIAS) * ALPHA), approx=True)
    wei = wei * INV_WEI0

    # delta = exp(-sigma * |outS_p - target|) * (lam + rho * curr)
    delta = jnp.exp(-SIGMA * jnp.abs(oSp - t)) * lam

    wei = jnp.clip(wei + delta, 0.0, 1.0)

    # fused weighted difference: outS*wei - target*wei == (outS - target)*wei
    diff = (oS - t) * wei
    sq = diff * diff

    # Fold (tr, 128) -> (tr/8, 8, 128); sum over leading axis is pure VPU adds.
    tr = sq.shape[0]
    part = jnp.sum(sq.reshape(tr // SUBLANES, SUBLANES, LANES), axis=0)
    psum_ref[...] = part.reshape(1, SUBLANES, LANES)


def ail_loss(outS, outS_p, outT, target, curr, *, max_tile_rows=2048):
    """Pallas TPU implementation of ailLoss.forward (size_average=True)."""
    n_total = int(np.prod(outS.shape))

    # Tile selection: large row tiles, multiple of 8 sublanes; pad rows so the
    # tile divides evenly (zero padding contributes 0 to the sum-of-squares).
    rows = pl.cdiv(n_total, LANES)
    tr = min(int(max_tile_rows), rows)
    tr = ((tr + SUBLANES - 1) // SUBLANES) * SUBLANES
    rows_padded = ((rows + tr - 1) // tr) * tr
    n_padded = rows_padded * LANES
    grid = rows_padded // tr

    def flat(x):
        # No wrapper dtype cast: keep native dtype (e.g. bf16) to halve HBM
        # traffic; the kernel upcasts per tile.
        x = jnp.reshape(x, (-1,))
        if n_padded != n_total:
            x = jnp.pad(x, (0, n_padded - n_total))
        return jnp.reshape(x, (rows_padded, LANES))

    outS2, outSp2, outT2, tgt2 = map(flat, (outS, outS_p, outT, target))
    lam = jnp.reshape(LAM + RHO * jnp.asarray(curr, dtype=jnp.float32), (1,))

    data_spec = pl.BlockSpec((tr, LANES), lambda i: (i, 0))

    partials = pl.pallas_call(
        _ail_loss_kernel,
        out_shape=jax.ShapeDtypeStruct((grid, SUBLANES, LANES), jnp.float32),
        grid_spec=pl.GridSpec(
            grid=(grid,),
            in_specs=[
                pl.BlockSpec(memory_space=pltpu.SMEM),  # lam scalar
                data_spec,  # outS
                data_spec,  # outS_p
                data_spec,  # outT
                data_spec,  # target
            ],
            out_specs=pl.BlockSpec((1, SUBLANES, LANES), lambda i: (i, 0, 0)),
        ),
        compiler_params=pltpu.CompilerParams(
            dimension_semantics=("parallel",),
            vmem_limit_bytes=32 * 1024 * 1024,
        ),
    )(lam, outS2, outSp2, outT2, tgt2)

    # size_average=True -> mean over the true (unpadded) element count.
    return jnp.sum(partials) / jnp.float32(n_total)


def _ail_loss_ref(outS, outS_p, outT, target, curr):
    """Pure-JAX reference mirroring the PyTorch forward."""
    f32 = jnp.float32
    outS, outS_p, outT, target = (x.astype(f32)
                                  for x in (outS, outS_p, outT, target))
    err = jnp.abs(outT - target)
    wei = 1.0 / (1.0 + jnp.exp((err - BIAS) * ALPHA))
    wei = wei * INV_WEI0
    delta = jnp.exp(-SIGMA * jnp.abs(outS_p - target))
    delta = delta * (LAM + RHO * curr)
    wei = jnp.clip(wei + delta, 0.0, 1.0)
    return jnp.mean((outS * wei - target * wei) ** 2)


def _run_case(shape, curr, seed):
    key = jax.random.PRNGKey(seed)
    k1, k2, k3, k4 = jax.random.split(key, 4)
    outS = jax.random.normal(k1, shape, dtype=jnp.float32)
    outS_p = jax.random.normal(k2, shape, dtype=jnp.float32)
    outT = jax.random.normal(k3, shape, dtype=jnp.float32)
    target = jax.random.normal(k4, shape, dtype=jnp.float32)

    loss = ail_loss(outS, outS_p, outT, target, curr)
    jax.block_until_ready(loss)

    ref = _ail_loss_ref(outS, outS_p, outT, target, curr)
    np.testing.assert_allclose(np.asarray(loss), np.asarray(ref),
                               rtol=5e-3, atol=1e-6)


if __name__ == "__main__":
    # NCHW shape consistent with the module's intended use.
    _run_case((2, 4, 16, 16), curr=0.5, seed=0)
    # Odd element count: exercises the zero-padding / tail handling.
    _run_case((2, 3, 15, 17), curr=0.25, seed=1)
    print("KERNEL_OK")
</pallas_src>

<mosaic_0001>
module attributes {stable_mosaic.version = 11 : i64} {
  func.func @_ail_loss_kernel(%arg0: i32, %arg1: memref<1xf32, #tpu.memory_space<smem>>, %arg2: memref<16x128xf32, #tpu.memory_space<vmem>>, %arg3: memref<16x128xf32, #tpu.memory_space<vmem>>, %arg4: memref<16x128xf32, #tpu.memory_space<vmem>>, %arg5: memref<16x128xf32, #tpu.memory_space<vmem>>, %arg6: memref<1x8x128xf32, #tpu.memory_space<vmem>>) attributes {dimension_semantics = [#tpu.dimension_semantics<parallel>], iteration_bounds = array<i64: 1>, scalar_prefetch = 0 : i64, scratch_operands = 0 : i64, tpu.core_type = #tpu.core_type<tc>, window_params = [{transform_indices = @transform_0, window_bounds = array<i64: 1>}, {transform_indices = @transform_1, window_bounds = array<i64: 16, 128>}, {transform_indices = @transform_2, window_bounds = array<i64: 16, 128>}, {transform_indices = @transform_3, window_bounds = array<i64: 16, 128>}, {transform_indices = @transform_4, window_bounds = array<i64: 16, 128>}, {transform_indices = @transform_5, window_bounds = array<i64: 1, 8, 128>}]} {
    %c0 = arith.constant 0 : index
    %c0_0 = arith.constant 0 : index
    %0 = vector.load %arg5[%c0, %c0_0] : memref<16x128xf32, #tpu.memory_space<vmem>>, vector<16x128xf32>
    %c0_1 = arith.constant 0 : index
    %c0_2 = arith.constant 0 : index
    %1 = vector.load %arg4[%c0_1, %c0_2] : memref<16x128xf32, #tpu.memory_space<vmem>>, vector<16x128xf32>
    %c0_3 = arith.constant 0 : index
    %c0_4 = arith.constant 0 : index
    %2 = vector.load %arg2[%c0_3, %c0_4] : memref<16x128xf32, #tpu.memory_space<vmem>>, vector<16x128xf32>
    %c0_5 = arith.constant 0 : index
    %c0_6 = arith.constant 0 : index
    %3 = vector.load %arg3[%c0_5, %c0_6] : memref<16x128xf32, #tpu.memory_space<vmem>>, vector<16x128xf32>
    %c0_7 = arith.constant 0 : index
    %4 = memref.load %arg1[%c0_7] : memref<1xf32, #tpu.memory_space<smem>>
    %5 = arith.subf %1, %0 : vector<16x128xf32>
    %6 = math.absf %5 : vector<16x128xf32>
    %cst = arith.constant 0.00999999977 : f32
    %7 = vector.broadcast %cst : f32 to vector<16x128xf32>
    %8 = arith.subf %6, %7 : vector<16x128xf32>
    %cst_8 = arith.constant 1.000000e+02 : f32
    %9 = vector.broadcast %cst_8 : f32 to vector<16x128xf32>
    %10 = arith.mulf %8, %9 : vector<16x128xf32>
    %11 = math.exp %10 : vector<16x128xf32>
    %cst_9 = arith.constant 1.000000e+00 : f32
    %12 = vector.broadcast %cst_9 : f32 to vector<16x128xf32>
    %13 = arith.addf %12, %11 : vector<16x128xf32>
    %14 = tpu.reciprocal %13 {approx = true} : vector<16x128xf32> -> vector<16x128xf32>
    %cst_10 = arith.constant 1.36787939 : f32
    %15 = vector.broadcast %cst_10 : f32 to vector<16x128xf32>
    %16 = arith.mulf %14, %15 : vector<16x128xf32>
    %17 = arith.subf %3, %0 : vector<16x128xf32>
    %18 = math.absf %17 : vector<16x128xf32>
    %cst_11 = arith.constant -1.000000e+01 : f32
    %19 = vector.broadcast %cst_11 : f32 to vector<16x128xf32>
    %20 = arith.mulf %19, %18 : vector<16x128xf32>
    %21 = math.exp %20 : vector<16x128xf32>
    %22 = vector.broadcast %4 : f32 to vector<16x128xf32>
    %23 = arith.mulf %21, %22 : vector<16x128xf32>
    %24 = arith.addf %16, %23 : vector<16x128xf32>
    %cst_12 = arith.constant 0.000000e+00 : f32
    %cst_13 = arith.constant 1.000000e+00 : f32
    %25 = vector.broadcast %cst_12 : f32 to vector<16x128xf32>
    %26 = arith.maximumf %25, %24 : vector<16x128xf32>
    %27 = vector.broadcast %cst_13 : f32 to vector<16x128xf32>
    %28 = arith.minimumf %27, %26 : vector<16x128xf32>
    %29 = arith.subf %2, %0 : vector<16x128xf32>
    %30 = arith.mulf %29, %28 : vector<16x128xf32>
    %31 = arith.mulf %30, %30 : vector<16x128xf32>
    %32 = vector.shape_cast %31 : vector<16x128xf32> to vector<2x8x128xf32>
    %cst_14 = arith.constant dense<0.000000e+00> : vector<8x128xf32>
    %33 = vector.multi_reduction <add>, %32, %cst_14 [0] : vector<2x8x128xf32> to vector<8x128xf32>
    %34 = vector.shape_cast %33 : vector<8x128xf32> to vector<1x8x128xf32>
    %c0_15 = arith.constant 0 : index
    %c0_16 = arith.constant 0 : index
    %c0_17 = arith.constant 0 : index
    %35 = vector.load %arg6[%c0_15, %c0_16, %c0_17] : memref<1x8x128xf32, #tpu.memory_space<vmem>>, vector<1x8x128xf32>
    tpu.vector_store %arg6[%c0_15, %c0_16, %c0_17], %34 {strides = array<i32>} : memref<1x8x128xf32, #tpu.memory_space<vmem>>, vector<1x8x128xf32>,
    return
  }
  func.func @transform_0(%arg0: i32) -> i32 {
    %c0_i32 = arith.constant 0 : i32
    %c0_i32_0 = arith.constant 0 : i32
    return %c0_i32 : i32
  }
  func.func @transform_1(%arg0: i32) -> (i32, i32) {
    %c0_i32 = arith.constant 0 : i32
    %c0_i32_0 = arith.constant 0 : i32
    return %arg0, %c0_i32 : i32, i32
  }
  func.func @transform_2(%arg0: i32) -> (i32, i32) {
    %c0_i32 = arith.constant 0 : i32
    %c0_i32_0 = arith.constant 0 : i32
    return %arg0, %c0_i32 : i32, i32
  }
  func.func @transform_3(%arg0: i32) -> (i32, i32) {
    %c0_i32 = arith.constant 0 : i32
    %c0_i32_0 = arith.constant 0 : i32
    return %arg0, %c0_i32 : i32, i32
  }
  func.func @transform_4(%arg0: i32) -> (i32, i32) {
    %c0_i32 = arith.constant 0 : i32
    %c0_i32_0 = arith.constant 0 : i32
    return %arg0, %c0_i32 : i32, i32
  }
  func.func @transform_5(%arg0: i32) -> (i32, i32, i32) {
    %c0_i32 = arith.constant 0 : i32
    %c0_i32_0 = arith.constant 0 : i32
    %c0_i32_1 = arith.constant 0 : i32
    return %arg0, %c0_i32, %c0_i32_0 : i32, i32, i32
  }
}

</mosaic_0001>

<bundles_post_ra>
// kernel: tpu_custom_call.1
= control target key start
LH: loop header
LB: loop body
LE: loop exit
PB: predicated region body
PF: predicated region fallthrough
CT: control target
= control target key end

     0   :  { %11 = vsyncpa [#allocation4], 0  ;;  %s413_s0 = inlined_call_operand.<no memory space> [shape: f32[1], index: 0, kind: input, shape index: {}]   ;;  %s414_s1 = inlined_call_operand.hbm [shape: f32[16,128], index: 1, kind: input, shape index: {}]   ;;  %s415_s2 = inlined_call_operand.hbm [shape: f32[16,128], index: 2, kind: input, shape index: {}]   ;;  %s416_s3 = inlined_call_operand.hbm [shape: f32[16,128], index: 3, kind: input, shape index: {}]   ;;  %s417_s4 = inlined_call_operand.hbm [shape: f32[16,128], index: 4, kind: input, shape index: {}]   ;;  %s418_s5 = inlined_call_operand.hbm [shape: f32[1,8,128], index: 5, kind: output, shape index: {}]  }
   0x1   :  { %12 = vsyncpa [#allocation7], 0 }
   0x2   :  { %13 = vsyncpa [#allocation10], 0 }
   0x3   :  { %14 = vsyncpa [#allocation5], 0  ;;  %s287_s18 = smov [#allocation6]   ;;  %s288_s20 = smov [#allocation3]  }
   0x4   :  { %s34_s19 = sshll.u32 %s287_s18, 4  ;;  %s22_s21 = sshll.u32 %s288_s20, 4  ;;  %s35_s19 = int_to_ptr.vmem [resolvable:$true] %s34_s19  ;;  %s324_s21 = int_to_ptr.vmem [resolvable:$true] %s22_s21 }
   0x5   :  { %s169_s24 = scalar_lea.hbm %s415_s2, 256 }
   0x6   :  { %p170_p0 = scmp.ne.s32.totalorder %s415_s2, %s169_s24  ;;  %p173_p1 = scmp.lt.u32.totalorder %s169_s24, %s415_s2 }
   0x8   :  { %p175_p2 = pnand %p173_p1, %p170_p0 }
   0xa   :  { %178 = shalt.err (!%p175_p2)
}
   0xb   :  { %s179_s29 = scalar_lea.vmem %s35_s19, 256  ;;  %p184_p4 = scmp.lt.s32.totalorder %s35_s19, %s35_s19 }
   0xc   :  { %p180_p3 = scmp.ne.s32.totalorder %s35_s19, %s179_s29  ;;  %p185_p5 = scmp.lt.s32.totalorder %s179_s29, %s179_s29 }
   0xe   :  { %p186_p6 = por %p185_p5, %p184_p4 }
  0x10   :  { %p187_p7 = pnand %p186_p6, %p180_p3 }
  0x12   :  { %190 = shalt.err (!%p187_p7)
}
  0x13   :  { %s289_s30 = smov 128   ;;  %s290_s6 = smov 8  }
  0x14   :  { %40 = dma.hbm_to_vmem [thread:$0]  %s415_s2, 256, %s35_s19, [#allocation7], %s289_s30, %s289_s30, %s290_s6  }
  0x15   :  { %s191_s11 = scalar_lea.hbm %s414_s1, 256 }
  0x16   :  { %p192_p8 = scmp.ne.s32.totalorder %s414_s1, %s191_s11  ;;  %p195_p9 = scmp.lt.u32.totalorder %s191_s11, %s414_s1 }
  0x18   :  { %p197_p10 = pnand %p195_p9, %p192_p8 }
  0x1a   :  { %200 = shalt.err (!%p197_p10)
}
  0x1b   :  { %s201_s16 = scalar_lea.vmem %s324_s21, 256  ;;  %p206_p12 = scmp.lt.s32.totalorder %s324_s21, %s324_s21 }
  0x1c   :  { %p202_p11 = scmp.ne.s32.totalorder %s324_s21, %s201_s16  ;;  %p207_p13 = scmp.lt.s32.totalorder %s201_s16, %s201_s16 }
  0x1e   :  { %p208_p0 = por %p207_p13, %p206_p12 }
  0x20   :  { %p209_p1 = pnand %p208_p0, %p202_p11 }
  0x22   :  { %212 = shalt.err (!%p209_p1)
}
  0x23   :  { %28 = dma.hbm_to_vmem [thread:$0]  %s414_s1, 256, %s324_s21, [#allocation4], %s289_s30, %s289_s30, %s290_s6  }
  0x24   :  { %s291_s18 = smov [#allocation8]   ;;  %s292_s20 = smov [#allocation9]  }
  0x25   :  { %s46_s19 = sshll.u32 %s291_s18, 4  ;;  %s58_s22 = sshll.u32 %s292_s20, 4  ;;  %s47_s19 = int_to_ptr.vmem [resolvable:$true] %s46_s19  ;;  %s361_s22 = int_to_ptr.vmem [resolvable:$true] %s58_s22 }
  0x26   :  { %s213_s25 = scalar_lea.hbm %s416_s3, 256 }
  0x27   :  { %p214_p2 = scmp.ne.s32.totalorder %s416_s3, %s213_s25  ;;  %p217_p3 = scmp.lt.u32.totalorder %s213_s25, %s416_s3 }
  0x29   :  { %p219_p4 = pnand %p217_p3, %p214_p2 }
  0x2b   :  { %222 = shalt.err (!%p219_p4)
}
  0x2c   :  { %s223_s1 = scalar_lea.vmem %s47_s19, 256  ;;  %p228_p6 = scmp.lt.s32.totalorder %s47_s19, %s47_s19 }
  0x2d   :  { %p224_p5 = scmp.ne.s32.totalorder %s47_s19, %s223_s1  ;;  %p229_p7 = scmp.lt.s32.totalorder %s223_s1, %s223_s1 }
  0x2f   :  { %p230_p8 = por %p229_p7, %p228_p6 }
  0x31   :  { %p231_p9 = pnand %p230_p8, %p224_p5 }
  0x33   :  { %234 = shalt.err (!%p231_p9)
}
  0x34   :  { %52 = dma.hbm_to_vmem [thread:$0]  %s416_s3, 256, %s47_s19, [#allocation7], %s289_s30, %s289_s30, %s290_s6  }
  0x35   :  { %s235_s10 = scalar_lea.hbm %s417_s4, 256 }
  0x36   :  { %p236_p10 = scmp.ne.s32.totalorder %s417_s4, %s235_s10  ;;  %p239_p11 = scmp.lt.u32.totalorder %s235_s10, %s417_s4 }
  0x38   :  { %p241_p12 = pnand %p239_p11, %p236_p10 }
  0x3a   :  { %244 = shalt.err (!%p241_p12)
}
  0x3b   :  { %s245_s15 = scalar_lea.vmem %s361_s22, 256  ;;  %p250_p0 = scmp.lt.s32.totalorder %s361_s22, %s361_s22 }
  0x3c   :  { %p246_p13 = scmp.ne.s32.totalorder %s361_s22, %s245_s15  ;;  %p251_p1 = scmp.lt.s32.totalorder %s245_s15, %s245_s15 }
  0x3e   :  { %p252_p2 = por %p251_p1, %p250_p0 }
  0x40   :  { %p253_p3 = pnand %p252_p2, %p246_p13 }
  0x42   :  { %256 = shalt.err (!%p253_p3)
}
  0x43   :  { %64 = dma.hbm_to_vmem [thread:$0]  %s417_s4, 256, %s361_s22, [#allocation10], %s289_s30, %s289_s30, %s290_s6  }
  0x44   :  { %279 = dma.done.wait [#allocation4], 256  }
  0x45   :  { %280 = vsyncadd [#allocation4], 4294967040 }
  0x46   :  { %281 = dma.done.wait [#allocation7], 512  }
  0x47   :  { %282 = vsyncadd [#allocation7], 4294966784 }
  0x48   :  { %283 = dma.done.wait [#allocation10], 256  }
  0x49   :  { %284 = vsyncadd [#allocation10], 4294967040  ;;  %v77_v0 = vld [vmem:[#allocation9] sm:$0xff]  ;;  %v78_v1 = vld [vmem:[#allocation9 + $0x8] sm:$0xff]  ;;  %v114_v29 = vstv %s413_s0  ;;  %s293_s0 = smov [#allocation11]  }
  0x4a   :  { %v79_v2 = vld [vmem:[#allocation8] sm:$0xff]  ;;  %v80_v3 = vld [vmem:[#allocation8 + $0x8] sm:$0xff]  ;;  %v83_v5 = vld [vmem:[#allocation6] sm:$0xff]  ;;  %s137_s6 = sshll.u32 %s293_s0, 4  ;;  %s138_s6 = int_to_ptr.vmem [resolvable:$true] %s137_s6 }
  0x4b   :  { %v86_v4 = vsub.f32 %v79_v2, %v77_v0  ;;  %v84_v6 = vld [vmem:[#allocation6 + $0x8] sm:$0xff]  ;;  %v87_v7 = vsub.f32 %v80_v3, %v78_v1  ;;  %v104_v10 = vsub.f32 %v83_v5, %v77_v0  ;;  %v81_v36 = vld [vmem:[#allocation3] sm:$0xff]  ;;  %v82_v38 = vld [vmem:[#allocation3 + $0x8] sm:$0xff]  ;;  %s257_s2 = scalar_lea.vmem %s138_s6, 128  ;;  %p262_p5 = scmp.lt.s32.totalorder %s138_s6, %s138_s6 }
  0x4c   :  { %v105_v12 = vsub.f32 %v84_v6, %v78_v1  ;;  %v123_v42 = vsub.f32 %v81_v36, %v77_v0  ;;  %v124_v44 = vsub.f32 %v82_v38, %v78_v1  ;;  %p258_p4 = scmp.ne.s32.totalorder %s138_s6, %s257_s2  ;;  %p263_p6 = scmp.lt.s32.totalorder %s257_s2, %s257_s2 }
  0x4d   :  { %v88_v8 = vand.u32 2147483647, %v86_v4  ;;  %v89_v9 = vand.u32 2147483647, %v87_v7  ;;  %v106_v16 = vand.u32 2147483647, %v104_v10 }
  0x4e   :  { %v107_v18 = vand.u32 2147483647, %v105_v12  ;;  %p264_p7 = por %p263_p6, %p262_p5 }
  0x4f   :  { %v148_v11 = vadd.f32 -0.01, %v88_v8  ;;  %v149_v13 = vadd.f32 -0.01, %v89_v9  ;;  %v108_v20 = vmul.f32 -10.0, %v106_v16 }
  0x50   :  { %v109_v21 = vmul.f32 -10.0, %v107_v18  ;;  %p265_p8 = pnand %p264_p7, %p258_p4 }
  0x51   :  { %v92_v14 = vmul.f32 100.0, %v148_v11  ;;  %v93_v15 = vmul.f32 100.0, %v149_v13  ;;  %v110_v22 = vmul.f32 1.442695, %v108_v20 }
  0x52   :  { %v112_v23 = vmul.f32 1.442695, %v109_v21 }
  0x53   :  { %v94_v17 = vmul.f32 1.442695, %v92_v14  ;;  %v96_v19 = vmul.f32 1.442695, %v93_v15 }
  0x55   :  { %157 = vpow2.f32 %v94_v17 }
  0x56   :  { %159 = vpow2.f32 %v96_v19 }
  0x57   :  { %161 = vpow2.f32 %v110_v22 }
  0x58   :  { %163 = vpow2.f32 %v112_v23 }
  0x5f   :  { %v158_v24 = vpop.eup %157 }
  0x60   :  { %v160_v25 = vpop.eup %159  ;;  %v98_v26 = vadd.f32 1.0, %v158_v24 }
  0x61   :  { %v99_v27 = vadd.f32 1.0, %v160_v25  ;;  %v162_v28 = vpop.eup %161 }
  0x62   :  { %165 = vrcp.f32 %v98_v26  ;;  %v164_v30 = vpop.eup %163  ;;  %v115_v31 = vmul.f32 %v162_v28, %v114_v29 }
  0x63   :  { %167 = vrcp.f32 %v99_v27  ;;  %v116_v33 = vmul.f32 %v164_v30, %v114_v29 }
  0x6c   :  { %v166_v32 = vpop.eup %165 }
  0x6d   :  { %v168_v34 = vpop.eup %167  ;;  %v102_v35 = vmul.f32 1.3678794, %v166_v32 }
  0x6e   :  { %v103_v37 = vmul.f32 1.3678794, %v168_v34 }
  0x6f   :  { %v117_v39 = vadd.f32 %v115_v31, %v102_v35 }
  0x70   :  { %v118_v40 = vadd.f32 %v116_v33, %v103_v37 }
  0x71   :  { %v119_v41 = vmax.f32 %v117_v39, 0.0 }
  0x72   :  { %v120_v43 = vmax.f32 %v118_v40, 0.0 }
  0x73   :  { %v121_v45 = vmin.f32 %v119_v41, 1.0 }
  0x74   :  { %v122_v46 = vmin.f32 %v120_v43, 1.0 }
  0x75   :  { %v125_v47 = vmul.f32 %v123_v42, %v121_v45 }
  0x76   :  { %v126_v48 = vmul.f32 %v124_v44, %v122_v46 }
  0x77   :  { %v127_v49 = vmul.f32 %v125_v47, %v125_v47 }
  0x78   :  { %v128_v50 = vmul.f32 %v126_v48, %v126_v48 }
  0x7a   :  { %v129_v51 = vadd.f32 %v128_v50, %v127_v49 }
  0x7c   :  { %130 = vst [vmem:[#allocation11] sm:$0xff] %v129_v51 }
  0x7d   :  { %268 = shalt.err (!%p265_p8)
}
  0x7e   :  { %s269_s19 = scalar_lea.hbm %s418_s5, 128 }
  0x7f   :  { %p270_p9 = scmp.ne.s32.totalorder %s418_s5, %s269_s19  ;;  %p273_p10 = scmp.lt.u32.totalorder %s269_s19, %s418_s5 }
  0x81   :  { %p275_p11 = pnand %p273_p10, %p270_p9 }
  0x83   :  { %278 = shalt.err (!%p275_p11)
}
  0x84   :  { %140 = dma.vmem_to_hbm [thread:$0]  %s138_s6, 128, %s418_s5, [#allocation5]  }
  0x85   :  { %285 = dma.done.wait [#allocation5], 128  }
  0x86   :  { %286 = vsyncadd [#allocation5], 4294967168 }
  0x87   :  { %144 = vsyncpa [#allocation4], 1 }
  0x88   :  { %145 = vsyncpa [#allocation7], 1 }
  0x89   :  { %146 = vsyncpa [#allocation10], 1 }
  0x8a   :  { %147 = vsyncpa [#allocation5], 1 }

</bundles_post_ra>
